<compile_context>
chip_gen: v7x
topology: tpu7x:2x2x1
jax: 0.10.0
libtpu: 0.0.40
codegen_flags: <defaults>
</compile_context>

<pallas_src>
import functools

import jax
import jax.numpy as jnp
from jax import lax
from jax.experimental import pallas as pl
from jax.experimental.pallas import tpu as pltpu

IGNORE = -100000.0                      # matches the PyTorch module's IGNORE buffer
_VMEM_LIMIT = 48 * 1024 * 1024          # headroom below v7x's 64 MiB per-TC VMEM


def _pick_tile(n, target=256):
    """Largest tile <= target that divides n and is sublane-aligned (or the full dim)."""
    if n <= target:
        return n
    for t in range(target, 7, -1):
        if n % t == 0 and t % 8 == 0:
            return t
    return n


# ---------------------------------------------------------------------------
# Stage 1: fused QKV projection (all heads in one matmul per weight).
# ---------------------------------------------------------------------------
def _qkv_kernel(x_ref, wq_ref, wk_ref, wv_ref, bq_ref, bk_ref, bv_ref,
                q_ref, k_ref, v_ref, *, scale):
    x = x_ref[0]                                                      # (TR, D)
    q = jnp.dot(x, wq_ref[...], preferred_element_type=jnp.float32) + bq_ref[...]
    k = jnp.dot(x, wk_ref[...], preferred_element_type=jnp.float32) + bk_ref[...]
    v = jnp.dot(x, wv_ref[...], preferred_element_type=jnp.float32) + bv_ref[...]
    q_ref[0] = (q * scale).astype(q_ref.dtype)                        # scale folded into q
    k_ref[0] = k.astype(k_ref.dtype)
    v_ref[0] = v.astype(v_ref.dtype)


# ---------------------------------------------------------------------------
# Stage 2: flash attention with online softmax + causal tile skipping.
# ---------------------------------------------------------------------------
def _flash_kernel(q_ref, k_ref, v_ref, z_ref, m_sc, l_sc, acc_sc, *, tq, tk):
    qi = pl.program_id(2)
    ki = pl.program_id(3)
    nk = pl.num_programs(3)

    @pl.when(ki == 0)
    def _():
        m_sc[...] = jnp.full_like(m_sc, -jnp.inf)
        l_sc[...] = jnp.zeros_like(l_sc)
        acc_sc[...] = jnp.zeros_like(acc_sc)

    # Skip kv tiles that lie entirely above the causal diagonal (~2x FLOP saving).
    @pl.when(ki * tk <= qi * tq + (tq - 1))
    def _():
        q = q_ref[0, 0]                                               # (TQ, Dh), pre-scaled
        k = k_ref[0, 0]                                               # (TK, Dh)
        v = v_ref[0, 0]                                               # (TK, Dh)
        # q @ k^T without materializing a transpose of k.
        s = lax.dot_general(q, k, (((1,), (1,)), ((), ())),
                            preferred_element_type=jnp.float32)       # (TQ, TK)
        qpos = qi * tq + lax.broadcasted_iota(jnp.int32, (tq, tk), 0)
        kpos = ki * tk + lax.broadcasted_iota(jnp.int32, (tq, tk), 1)
        s = jnp.where(kpos > qpos, IGNORE, s)

        m_prev = m_sc[...]
        m_new = jnp.maximum(m_prev, jnp.max(s, axis=-1, keepdims=True))
        alpha = jnp.exp(m_prev - m_new)
        p = jnp.exp(s - m_new)
        l_sc[...] = alpha * l_sc[...] + jnp.sum(p, axis=-1, keepdims=True)
        acc_sc[...] = alpha * acc_sc[...] + jnp.dot(
            p.astype(v.dtype), v, preferred_element_type=jnp.float32)
        m_sc[...] = m_new

    @pl.when(ki == nk - 1)
    def _():
        inv_l = pl.reciprocal(l_sc[...], approx=True)                 # EUP slot, ~free
        z_ref[0, 0] = (acc_sc[...] * inv_l).astype(z_ref.dtype)


# ---------------------------------------------------------------------------
# Stage 3: output projection over concatenated heads (K = H*Dh contraction).
# ---------------------------------------------------------------------------
def _out_proj_kernel(z_ref, wo_ref, bo_ref, o_ref):
    o_ref[0] = (jnp.dot(z_ref[0], wo_ref[...], preferred_element_type=jnp.float32)
                + bo_ref[...]).astype(o_ref.dtype)


def attention_pallas(x, W_Q, W_K, W_V, W_O, b_Q, b_K, b_V, b_O,
                     *, tq=None, tk=None, tr=None):
    B, S, D = x.shape
    H, _, Dh = W_Q.shape
    dtype = x.dtype

    tr = tr or _pick_tile(S, 256)
    tq = tq or _pick_tile(S, 256)
    tk = tk or _pick_tile(S, 256)

    # Head-fused weight / bias layouts (host-side, negligible).
    Wq2 = jnp.transpose(W_Q, (1, 0, 2)).reshape(D, H * Dh)
    Wk2 = jnp.transpose(W_K, (1, 0, 2)).reshape(D, H * Dh)
    Wv2 = jnp.transpose(W_V, (1, 0, 2)).reshape(D, H * Dh)
    Wo2 = W_O.reshape(H * Dh, D)
    bq2 = b_Q.reshape(1, H * Dh)
    bk2 = b_K.reshape(1, H * Dh)
    bv2 = b_V.reshape(1, H * Dh)
    bo2 = b_O.reshape(1, D)

    # ---- stage 1: fused QKV projection ------------------------------------
    row_in = pl.BlockSpec((1, tr, D), lambda b, r: (b, r, 0))
    row_out = pl.BlockSpec((1, tr, H * Dh), lambda b, r: (b, r, 0))
    w_spec = pl.BlockSpec((D, H * Dh), lambda b, r: (0, 0))
    bias_spec = pl.BlockSpec((1, H * Dh), lambda b, r: (0, 0))

    qkv_shape = jax.ShapeDtypeStruct((B, S, H * Dh), dtype)
    q, k, v = pl.pallas_call(
        functools.partial(_qkv_kernel, scale=float(Dh) ** -0.5),
        out_shape=(qkv_shape, qkv_shape, qkv_shape),
        grid_spec=pltpu.PrefetchScalarGridSpec(
            num_scalar_prefetch=0,
            grid=(B, S // tr),
            in_specs=[row_in, w_spec, w_spec, w_spec,
                      bias_spec, bias_spec, bias_spec],
            out_specs=[row_out, row_out, row_out],
        ),
        compiler_params=pltpu.CompilerParams(
            dimension_semantics=("parallel", "parallel"),
            vmem_limit_bytes=_VMEM_LIMIT),
    )(x, Wq2, Wk2, Wv2, bq2, bk2, bv2)

    # Layout plumbing (cheap HBM pass in XLA): head-major (B, H, S, Dh).
    q4 = q.reshape(B, S, H, Dh).transpose(0, 2, 1, 3)
    k4 = k.reshape(B, S, H, Dh).transpose(0, 2, 1, 3)
    v4 = v.reshape(B, S, H, Dh).transpose(0, 2, 1, 3)

    # ---- stage 2: flash attention ------------------------------------------
    nq, nk = S // tq, S // tk
    q_spec = pl.BlockSpec((1, 1, tq, Dh), lambda b, h, qi, ki: (b, h, qi, 0))
    kv_spec = pl.BlockSpec((1, 1, tk, Dh), lambda b, h, qi, ki: (b, h, ki, 0))
    z_spec = pl.BlockSpec((1, 1, tq, Dh), lambda b, h, qi, ki: (b, h, qi, 0))

    z = pl.pallas_call(
        functools.partial(_flash_kernel, tq=tq, tk=tk),
        out_shape=jax.ShapeDtypeStruct((B, H, S, Dh), dtype),
        grid_spec=pltpu.PrefetchScalarGridSpec(
            num_scalar_prefetch=0,
            grid=(B, H, nq, nk),
            in_specs=[q_spec, kv_spec, kv_spec],
            out_specs=z_spec,
            scratch_shapes=[pltpu.VMEM((tq, 1), jnp.float32),   # running max m
                            pltpu.VMEM((tq, 1), jnp.float32),   # running sum l
                            pltpu.VMEM((tq, Dh), jnp.float32)], # output accumulator
        ),
        compiler_params=pltpu.CompilerParams(
            dimension_semantics=("parallel", "parallel", "parallel", "arbitrary"),
            vmem_limit_bytes=_VMEM_LIMIT),
    )(q4, k4, v4)

    # Concatenate heads back: (B, S, H*Dh).
    z_flat = z.transpose(0, 2, 1, 3).reshape(B, S, H * Dh)

    # ---- stage 3: output projection -----------------------------------------
    out = pl.pallas_call(
        _out_proj_kernel,
        out_shape=jax.ShapeDtypeStruct((B, S, D), dtype),
        grid_spec=pltpu.PrefetchScalarGridSpec(
            num_scalar_prefetch=0,
            grid=(B, S // tr),
            in_specs=[pl.BlockSpec((1, tr, H * Dh), lambda b, r: (b, r, 0)),
                      pl.BlockSpec((H * Dh, D), lambda b, r: (0, 0)),
                      pl.BlockSpec((1, D), lambda b, r: (0, 0))],
            out_specs=pl.BlockSpec((1, tr, D), lambda b, r: (b, r, 0)),
        ),
        compiler_params=pltpu.CompilerParams(
            dimension_semantics=("parallel", "parallel"),
            vmem_limit_bytes=_VMEM_LIMIT),
    )(z_flat, Wo2, bo2)

    return out


def attention_reference(x, W_Q, W_K, W_V, W_O, b_Q, b_K, b_V, b_O):
    """Pure JAX replica of the PyTorch Attention.forward semantics."""
    d_head = W_Q.shape[-1]
    q = jnp.einsum('bpd,hde->bphe', x, W_Q) + b_Q
    k = jnp.einsum('bpd,hde->bphe', x, W_K) + b_K
    v = jnp.einsum('bpd,hde->bphe', x, W_V) + b_V
    scores = jnp.einsum('bqhe,bkhe->bhqk', q, k) / (d_head ** 0.5)
    S = x.shape[1]
    mask = jnp.triu(jnp.ones((S, S), dtype=bool), k=1)
    scores = jnp.where(mask, IGNORE, scores)
    probs = jax.nn.softmax(scores, axis=-1)
    z = jnp.einsum('bhqk,bkhe->bqhe', probs, v)
    return jnp.einsum('bqhe,hed->bqd', z, W_O) + b_O


if __name__ == "__main__":
    # Small config consistent with the module's shape conventions.
    batch, seq = 2, 8
    d_model, n_heads, d_head = 32, 4, 8
    init_range = 0.02

    key = jax.random.PRNGKey(0)
    kx, kq, kk, kv, ko, kbq, kbk, kbv, kbo = jax.random.split(key, 9)

    x = jax.random.normal(kx, (batch, seq, d_model), dtype=jnp.float32)
    W_Q = init_range * jax.random.normal(kq, (n_heads, d_model, d_head), dtype=jnp.float32)
    W_K = init_range * jax.random.normal(kk, (n_heads, d_model, d_head), dtype=jnp.float32)
    W_V = init_range * jax.random.normal(kv, (n_heads, d_model, d_head), dtype=jnp.float32)
    W_O = init_range * jax.random.normal(ko, (n_heads, d_head, d_model), dtype=jnp.float32)
    b_Q = init_range * jax.random.normal(kbq, (n_heads, d_head), dtype=jnp.float32)
    b_K = init_range * jax.random.normal(kbk, (n_heads, d_head), dtype=jnp.float32)
    b_V = init_range * jax.random.normal(kbv, (n_heads, d_head), dtype=jnp.float32)
    b_O = init_range * jax.random.normal(kbo, (d_model,), dtype=jnp.float32)

    out = attention_pallas(x, W_Q, W_K, W_V, W_O, b_Q, b_K, b_V, b_O)
    out = jax.block_until_ready(out)

    ref = attention_reference(x, W_Q, W_K, W_V, W_O, b_Q, b_K, b_V, b_O)
    assert out.shape == (batch, seq, d_model)
    # Tolerance accounts for the approximate (EUP) reciprocal in the softmax denominator.
    assert jnp.allclose(out, ref, atol=1e-4, rtol=1e-3), "Pallas output mismatch vs reference"

    print("KERNEL_OK")
</pallas_src>

<mosaic_0001>
module attributes {stable_mosaic.version = 11 : i64} {
  func.func @_qkv_kernel(%arg0: i32, %arg1: i32, %arg2: memref<1x8x32xf32, #tpu.memory_space<vmem>>, %arg3: memref<32x32xf32, #tpu.memory_space<vmem>>, %arg4: memref<32x32xf32, #tpu.memory_space<vmem>>, %arg5: memref<32x32xf32, #tpu.memory_space<vmem>>, %arg6: memref<1x32xf32, #tpu.memory_space<vmem>>, %arg7: memref<1x32xf32, #tpu.memory_space<vmem>>, %arg8: memref<1x32xf32, #tpu.memory_space<vmem>>, %arg9: memref<1x8x32xf32, #tpu.memory_space<vmem>>, %arg10: memref<1x8x32xf32, #tpu.memory_space<vmem>>, %arg11: memref<1x8x32xf32, #tpu.memory_space<vmem>>) attributes {dimension_semantics = [#tpu.dimension_semantics<parallel>, #tpu.dimension_semantics<parallel>], iteration_bounds = array<i64: 2, 1>, scalar_prefetch = 0 : i64, scratch_operands = 0 : i64, tpu.core_type = #tpu.core_type<tc>, window_params = [{transform_indices = @transform_0, window_bounds = array<i64: 1, 8, 32>}, {pipeline_mode = #tpu.pipeline_mode<synchronous>, transform_indices = @transform_1, window_bounds = array<i64: 32, 32>}, {pipeline_mode = #tpu.pipeline_mode<synchronous>, transform_indices = @transform_2, window_bounds = array<i64: 32, 32>}, {pipeline_mode = #tpu.pipeline_mode<synchronous>, transform_indices = @transform_3, window_bounds = array<i64: 32, 32>}, {pipeline_mode = #tpu.pipeline_mode<synchronous>, transform_indices = @transform_4, window_bounds = array<i64: 1, 32>}, {pipeline_mode = #tpu.pipeline_mode<synchronous>, transform_indices = @transform_5, window_bounds = array<i64: 1, 32>}, {pipeline_mode = #tpu.pipeline_mode<synchronous>, transform_indices = @transform_6, window_bounds = array<i64: 1, 32>}, {transform_indices = @transform_7, window_bounds = array<i64: 1, 8, 32>}, {transform_indices = @transform_8, window_bounds = array<i64: 1, 8, 32>}, {transform_indices = @transform_9, window_bounds = array<i64: 1, 8, 32>}]} {
    %c0 = arith.constant 0 : index
    %c0_0 = arith.constant 0 : index
    %c0_1 = arith.constant 0 : index
    %0 = vector.load %arg2[%c0, %c0_0, %c0_1] : memref<1x8x32xf32, #tpu.memory_space<vmem>>, vector<1x8x32xf32>
    %1 = vector.shape_cast %0 : vector<1x8x32xf32> to vector<8x32xf32>
    %c0_2 = arith.constant 0 : index
    %c0_3 = arith.constant 0 : index
    %2 = vector.load %arg3[%c0_2, %c0_3] : memref<32x32xf32, #tpu.memory_space<vmem>>, vector<32x32xf32>
    %cst = arith.constant dense<0.000000e+00> : vector<8x32xf32>
    %3 = tpu.matmul %1, %2, %cst {dimension_numbers = #tpu.dot_dimension_numbers<[1], [0], [0], [1], [0, 0, 1, 1], [], []>} : vector<8x32xf32>, vector<32x32xf32>, vector<8x32xf32> -> vector<8x32xf32>
    %c0_4 = arith.constant 0 : index
    %c0_5 = arith.constant 0 : index
    %4 = vector.load %arg6[%c0_4, %c0_5] : memref<1x32xf32, #tpu.memory_space<vmem>>, vector<1x32xf32>
    %5 = vector.broadcast %4 : vector<1x32xf32> to vector<8x32xf32>
    %6 = arith.addf %3, %5 : vector<8x32xf32>
    %c0_6 = arith.constant 0 : index
    %c0_7 = arith.constant 0 : index
    %7 = vector.load %arg4[%c0_6, %c0_7] : memref<32x32xf32, #tpu.memory_space<vmem>>, vector<32x32xf32>
    %cst_8 = arith.constant dense<0.000000e+00> : vector<8x32xf32>
    %8 = tpu.matmul %1, %7, %cst_8 {dimension_numbers = #tpu.dot_dimension_numbers<[1], [0], [0], [1], [0, 0, 1, 1], [], []>} : vector<8x32xf32>, vector<32x32xf32>, vector<8x32xf32> -> vector<8x32xf32>
    %c0_9 = arith.constant 0 : index
    %c0_10 = arith.constant 0 : index
    %9 = vector.load %arg7[%c0_9, %c0_10] : memref<1x32xf32, #tpu.memory_space<vmem>>, vector<1x32xf32>
    %10 = vector.broadcast %9 : vector<1x32xf32> to vector<8x32xf32>
    %11 = arith.addf %8, %10 : vector<8x32xf32>
    %c0_11 = arith.constant 0 : index
    %c0_12 = arith.constant 0 : index
    %12 = vector.load %arg5[%c0_11, %c0_12] : memref<32x32xf32, #tpu.memory_space<vmem>>, vector<32x32xf32>
    %cst_13 = arith.constant dense<0.000000e+00> : vector<8x32xf32>
    %13 = tpu.matmul %1, %12, %cst_13 {dimension_numbers = #tpu.dot_dimension_numbers<[1], [0], [0], [1], [0, 0, 1, 1], [], []>} : vector<8x32xf32>, vector<32x32xf32>, vector<8x32xf32> -> vector<8x32xf32>
    %c0_14 = arith.constant 0 : index
    %c0_15 = arith.constant 0 : index
    %14 = vector.load %arg8[%c0_14, %c0_15] : memref<1x32xf32, #tpu.memory_space<vmem>>, vector<1x32xf32>
    %15 = vector.broadcast %14 : vector<1x32xf32> to vector<8x32xf32>
    %16 = arith.addf %13, %15 : vector<8x32xf32>
    %cst_16 = arith.constant 0.353553385 : f32
    %17 = vector.broadcast %cst_16 : f32 to vector<8x32xf32>
    %18 = arith.mulf %6, %17 : vector<8x32xf32>
    %c0_17 = arith.constant 0 : index
    %c0_18 = arith.constant 0 : index
    %c0_19 = arith.constant 0 : index
    %19 = vector.load %arg9[%c0_17, %c0_18, %c0_19] : memref<1x8x32xf32, #tpu.memory_space<vmem>>, vector<1x8x32xf32>
    %20 = vector.shape_cast %19 : vector<1x8x32xf32> to vector<8x32xf32>
    %21 = vector.shape_cast %18 : vector<8x32xf32> to vector<1x8x32xf32>
    tpu.vector_store %arg9[%c0_17, %c0_18, %c0_19], %21 {strides = array<i32>} : memref<1x8x32xf32, #tpu.memory_space<vmem>>, vector<1x8x32xf32>,
    %c0_20 = arith.constant 0 : index
    %c0_21 = arith.constant 0 : index
    %c0_22 = arith.constant 0 : index
    %22 = vector.load %arg10[%c0_20, %c0_21, %c0_22] : memref<1x8x32xf32, #tpu.memory_space<vmem>>, vector<1x8x32xf32>
    %23 = vector.shape_cast %22 : vector<1x8x32xf32> to vector<8x32xf32>
    %24 = vector.shape_cast %11 : vector<8x32xf32> to vector<1x8x32xf32>
    tpu.vector_store %arg10[%c0_20, %c0_21, %c0_22], %24 {strides = array<i32>} : memref<1x8x32xf32, #tpu.memory_space<vmem>>, vector<1x8x32xf32>,
    %c0_23 = arith.constant 0 : index
    %c0_24 = arith.constant 0 : index
    %c0_25 = arith.constant 0 : index
    %25 = vector.load %arg11[%c0_23, %c0_24, %c0_25] : memref<1x8x32xf32, #tpu.memory_space<vmem>>, vector<1x8x32xf32>
    %26 = vector.shape_cast %25 : vector<1x8x32xf32> to vector<8x32xf32>
    %27 = vector.shape_cast %16 : vector<8x32xf32> to vector<1x8x32xf32>
    tpu.vector_store %arg11[%c0_23, %c0_24, %c0_25], %27 {strides = array<i32>} : memref<1x8x32xf32, #tpu.memory_space<vmem>>, vector<1x8x32xf32>,
    return
  }
  func.func @transform_0(%arg0: i32, %arg1: i32) -> (i32, i32, i32) {
    %c0_i32 = arith.constant 0 : i32
    %c0_i32_0 = arith.constant 0 : i32
    return %arg0, %arg1, %c0_i32 : i32, i32, i32
  }
  func.func @transform_1(%arg0: i32, %arg1: i32) -> (i32, i32) {
    %c0_i32 = arith.constant 0 : i32
    %c0_i32_0 = arith.constant 0 : i32
    %c0_i32_1 = arith.constant 0 : i32
    return %c0_i32, %c0_i32_0 : i32, i32
  }
  func.func @transform_2(%arg0: i32, %arg1: i32) -> (i32, i32) {
    %c0_i32 = arith.constant 0 : i32
    %c0_i32_0 = arith.constant 0 : i32
    %c0_i32_1 = arith.constant 0 : i32
    return %c0_i32, %c0_i32_0 : i32, i32
  }
  func.func @transform_3(%arg0: i32, %arg1: i32) -> (i32, i32) {
    %c0_i32 = arith.constant 0 : i32
    %c0_i32_0 = arith.constant 0 : i32
    %c0_i32_1 = arith.constant 0 : i32
    return %c0_i32, %c0_i32_0 : i32, i32
  }
  func.func @transform_4(%arg0: i32, %arg1: i32) -> (i32, i32) {
    %c0_i32 = arith.constant 0 : i32
    %c0_i32_0 = arith.constant 0 : i32
    %c0_i32_1 = arith.constant 0 : i32
    return %c0_i32, %c0_i32_0 : i32, i32
  }
  func.func @transform_5(%arg0: i32, %arg1: i32) -> (i32, i32) {
    %c0_i32 = arith.constant 0 : i32
    %c0_i32_0 = arith.constant 0 : i32
    %c0_i32_1 = arith.constant 0 : i32
    return %c0_i32, %c0_i32_0 : i32, i32
  }
  func.func @transform_6(%arg0: i32, %arg1: i32) -> (i32, i32) {
    %c0_i32 = arith.constant 0 : i32
    %c0_i32_0 = arith.constant 0 : i32
    %c0_i32_1 = arith.constant 0 : i32
    return %c0_i32, %c0_i32_0 : i32, i32
  }
  func.func @transform_7(%arg0: i32, %arg1: i32) -> (i32, i32, i32) {
    %c0_i32 = arith.constant 0 : i32
    %c0_i32_0 = arith.constant 0 : i32
    return %arg0, %arg1, %c0_i32 : i32, i32, i32
  }
  func.func @transform_8(%arg0: i32, %arg1: i32) -> (i32, i32, i32) {
    %c0_i32 = arith.constant 0 : i32
    %c0_i32_0 = arith.constant 0 : i32
    return %arg0, %arg1, %c0_i32 : i32, i32, i32
  }
  func.func @transform_9(%arg0: i32, %arg1: i32) -> (i32, i32, i32) {
    %c0_i32 = arith.constant 0 : i32
    %c0_i32_0 = arith.constant 0 : i32
    return %arg0, %arg1, %c0_i32 : i32, i32, i32
  }
}

</mosaic_0001>

<bundles_post_ra>
// kernel: tpu_custom_call.1
= control target key start
LH: loop header
LB: loop body
LE: loop exit
PB: predicated region body
PF: predicated region fallthrough
CT: control target
= control target key end

     0   :  { %s1822_s0 = inlined_call_operand.hbm [shape: f32[2,8,32], index: 0, kind: input, shape index: {}]   ;;  %s1823_s1 = inlined_call_operand.hbm [shape: f32[32,32], index: 1, kind: input, shape index: {}]   ;;  %s1824_s2 = inlined_call_operand.hbm [shape: f32[32,32], index: 2, kind: input, shape index: {}]   ;;  %s1825_s3 = inlined_call_operand.hbm [shape: f32[32,32], index: 3, kind: input, shape index: {}]   ;;  %s1826_s4 = inlined_call_operand.vmem [shape: f32[1,32], index: 4, kind: input, shape index: {}]   ;;  %s1827_s5 = inlined_call_operand.vmem [shape: f32[1,32], index: 5, kind: input, shape index: {}]   ;;  %s1828_s6 = inlined_call_operand.vmem [shape: f32[1,32], index: 6, kind: input, shape index: {}]   ;;  %s1829_s7 = inlined_call_operand.hbm [shape: f32[2,8,32], index: 7, kind: output, shape index: {0}]   ;;  %s1830_s8 = inlined_call_operand.hbm [shape: f32[2,8,32], index: 8, kind: output, shape index: {1}]   ;;  %s1831_s9 = inlined_call_operand.hbm [shape: f32[2,8,32], index: 9, kind: output, shape index: {2}]  }
   0x1   :  { %1842 = sst [smem:[#allocation21_spill]] %s1822_s0 }
   0x2   :  { %1843 = sst [smem:[#allocation22_spill]] %s1823_s1 }
   0x3   :  { %1844 = sst [smem:[#allocation23_spill]] %s1828_s6 }
   0x4   :  { %1845 = sst [smem:[#allocation24_spill]] %s1829_s7 }
   0x5   :  { %1846 = sst [smem:[#allocation25_spill]] %s1831_s9 }
   0x6   :  { %15 = vsyncpa [#allocation3], 0 }
   0x7   :  { %17 = vsyncpa [#allocation3 + $0x1], 0 }
   0x8   :  { %18 = vsyncpa [#allocation6], 0 }
   0x9   :  { %19 = vsyncpa [#allocation9], 0 }
   0xa   :  { %20 = vsyncpa [#allocation4], 0 }
   0xb   :  { %22 = vsyncpa [#allocation4 + $0x1], 0 }
   0xc   :  { %23 = vsyncpa [#allocation12], 0 }
   0xd   :  { %25 = vsyncpa [#allocation12 + $0x1], 0  ;;  %s1441_s30 = smov 0   ;;  %s1443_s10 = smov 0  }
   0xe   :  { %s1445_s11 = smov 0   ;;  %s1447_s12 = smov 0  }
   0xf   :  { %s1449_s13 = smov 0   ;;  %s1451_s14 = smov 0  }
  0x10 LB: > { %1847 = sst [smem:[#allocation19_spill]] %s1357_s30  ;;  %s1472_s15 = sadd.s32 4294967295, %s1377_s14   ;;  %s1377_s14 = sphi %s1451_s14, %s31_s14   ;;  %s1373_s13 = sphi %s1449_s13, %s1879_s13   ;;  %s1369_s12 = sphi %s1447_s12, %s1878_s12   ;;  %s1365_s11 = sphi %s1445_s11, %s1877_s11   ;;  %s1361_s10 = sphi %s1443_s10, %s1876_s10   ;;  %s1357_s30 = sphi %s1441_s30, %s1875_s30  }
  0x11   : > { %s1832_s16 = sadd.s32 4294967294, %s1377_s14   ;;  %p65_p0 = scmp.ne.s32.totalorder %s1361_s10, %s1357_s30 }
  0x12   : > { %p1834_p1 = scmp.eq.s32.totalorder %s1472_s15, 0  ;;  %p223_p3 = scmp.eq.s32.totalorder %s1832_s16, 1 }
  0x13   : > { %p910_p5 = scmp.ge.s32.totalorder %s1377_s14, 1  ;;  %p286_p7 = scmp.lt.s32.totalorder %s1377_s14, 3 }
  0x14   : > { %p1483_p4 = por %p1834_p1, %p65_p0  ;;  %p1488_p6 = por %p223_p3, %p65_p0 }
  0x15   : > { %p1493_p8 = pnand %p910_p5, %p286_p7  ;;  %s1379_s20 = smov [#allocation5]  }
  0x16   : > { %s1848_s17 = scalar_select %p1483_p4, 1, 0 }
  0x17   : > { %s1849_s18 = scalar_select %p1488_p6, 1, 0 }
  0x18   : > { %s1851_s19 = scalar_select %p1493_p8, 1, 0 }
  0x19   : > { %1850 = sst [smem:[#allocation20_spill]] %s1849_s18  ;;  %s298_s21 = sshll.u32 %s1379_s20, 4  ;;  %s1497_s21 = int_to_ptr.vmem [resolvable:$true] %s298_s21 }
  0x1a   : > { %p1025_p9 = pneg %p1493_p8  ;;  %s1380_s23 = smov [#allocation7]  }
  0x1b   : > { %s311_s24 = sshll.u32 %s1380_s23, 4  ;;  %s1381_s25 = smov [#allocation8]   ;;  %s1508_s24 = int_to_ptr.vmem [resolvable:$true] %s311_s24 }
  0x1c   : > { %p1504_p11 = pnand %p1025_p9, %p1834_p1  ;;  %s1510_s26 = sshll.u32 %s1381_s25, 4  ;;  %s325_s26 = int_to_ptr.vmem [resolvable:$true] %s1510_s26 }
  0x1d   : > { %s1853_s1 = sld [smem:[#allocation22_spill]] }
  0x1e   : > { %p1520_p13 = pneg %p1504_p11 }
  0x23   : > { %s1113_s29 = scalar_lea.hbm %s1853_s1, 512 }
  0x24   : > { %p1114_p12 = scmp.ne.s32.totalorder %s1853_s1, %s1113_s29  ;;  %p1120_p5 = scmp.lt.u32.totalorder %s1113_s29, %s1853_s1 }
  0x26   : > { %p1116_p0 = pnand %p1520_p13, %p1114_p12 }
  0x28   : > { %p1117_p3 = pneg %p1116_p0 }
  0x2a   : > { %p1122_p7 = pnand %p1120_p5, %p1117_p3 }
  0x2c   : > { %1125 = shalt.err (!%p1122_p7)
}
  0x2d   : > { %s1126_s16 = scalar_lea.vmem %s1497_s21, 512  ;;  %p1134_p2 = scmp.lt.s32.totalorder %s1497_s21, %s1497_s21 }
  0x2e   : > { %p1127_p9 = scmp.ne.s32.totalorder %s1497_s21, %s1126_s16  ;;  %p1135_p6 = scmp.lt.s32.totalorder %s1126_s16, %s1126_s16 }
  0x30   : > { %p1129_p10 = pnand %p1127_p9, %p1520_p13  ;;  %p1136_p12 = por %p1135_p6, %p1134_p2 }
  0x32   : > { %p1130_p1 = pneg %p1129_p10 }
  0x34   : > { %p1137_p0 = pnand %p1136_p12, %p1130_p1 }
  0x36   : > { %1140 = shalt.err (!%p1137_p0)
}
  0x37   : > { %s1382_s27 = smov 128   ;;  %s1383_s28 = smov 8  }
  0x38   : > { %1028 = dma.hbm_to_vmem [thread:$0]  (!%p1504_p11), %s1853_s1, 512, %s1497_s21, [#allocation6], %s1382_s27, %s1382_s27, %s1383_s28  }
  0x39   : > { %s1141_s16 = scalar_lea.hbm %s1824_s2, 512 }
  0x3a   : > { %p1142_p1 = scmp.ne.s32.totalorder %s1824_s2, %s1141_s16  ;;  %p1148_p10 = scmp.lt.u32.totalorder %s1141_s16, %s1824_s2 }
  0x3c   : > { %p1144_p2 = pnand %p1142_p1, %p1520_p13 }
  0x3e   : > { %p1145_p6 = pneg %p1144_p2 }
  0x40   : > { %p1150_p3 = pnand %p1148_p10, %p1145_p6 }
  0x42   : > { %1153 = shalt.err (!%p1150_p3)
}
  0x43   : > { %s1154_s21 = scalar_lea.vmem %s1508_s24, 512  ;;  %p1162_p12 = scmp.lt.s32.totalorder %s1508_s24, %s1508_s24 }
  0x44   : > { %p1155_p5 = scmp.ne.s32.totalorder %s1508_s24, %s1154_s21  ;;  %p1163_p0 = scmp.lt.s32.totalorder %s1154_s21, %s1154_s21 }
  0x46   : > { %p1157_p7 = pnand %p1155_p5, %p1520_p13  ;;  %p1164_p1 = por %p1163_p0, %p1162_p12 }
  0x48   : > { %p1158_p9 = pneg %p1157_p7 }
  0x4a   : > { %p1165_p2 = pnand %p1164_p1, %p1158_p9 }
  0x4c   : > { %1168 = shalt.err (!%p1165_p2)
}
  0x4d   : > { %1031 = dma.hbm_to_vmem [thread:$0]  (!%p1504_p11), %s1824_s2, 512, %s1508_s24, [#allocation6], %s1382_s27, %s1382_s27, %s1383_s28  }
  0x4e   : > { %s1169_s29 = scalar_lea.hbm %s1825_s3, 512 }
  0x4f   : > { %p1170_p6 = scmp.ne.s32.totalorder %s1825_s3, %s1169_s29  ;;  %p1176_p5 = scmp.lt.u32.totalorder %s1169_s29, %s1825_s3 }
  0x51   : > { %p1172_p10 = pnand %p1170_p6, %p1520_p13 }
  0x53   : > { %p1173_p3 = pneg %p1172_p10 }
  0x55   : > { %p1178_p7 = pnand %p1176_p5, %p1173_p3 }
  0x57   : > { %1181 = shalt.err (!%p1178_p7)
}
  0x58   : > { %s1182_s21 = scalar_lea.vmem %s325_s26, 512  ;;  %p1190_p1 = scmp.lt.s32.totalorder %s325_s26, %s325_s26 }
  0x59   : > { %p1183_p9 = scmp.ne.s32.totalorder %s325_s26, %s1182_s21  ;;  %p1191_p2 = scmp.lt.s32.totalorder %s1182_s21, %s1182_s21 }
  0x5b   : > { %p1185_p12 = pnand %p1183_p9, %p1520_p13  ;;  %p1192_p4 = por %p1191_p2, %p1190_p1 }
  0x5d   : > { %p1186_p0 = pneg %p1185_p12 }
  0x5f   : > { %p1193_p8 = pnand %p1192_p4, %p1186_p0 }
  0x61   : > { %1196 = shalt.err (!%p1193_p8)
}
  0x62   : > { %1034 = dma.hbm_to_vmem [thread:$0]  (!%p1504_p11), %s1825_s3, 512, %s325_s26, [#allocation9], %s1382_s27, %s1382_s27, %s1383_s28  }
  0x63   : > { %s52_s18 = sadd.s32 1, %s1365_s11  ;;  %s43_s22 = sadd.s32 1, %s1373_s13 }
  0x64   : > { %p59_p4 = scmp.ne.s32.totalorder %s1365_s11, %s1361_s10  ;;  %p45_p8 = scmp.ge.s32.totalorder %s43_s22, 2 }
  0x65   : > { %p60_p13 = scmp.eq.s32.totalorder %s1377_s14, 0  ;;  %p1855_p6 = scmp.eq.s32.totalorder %s1472_s15, 1 }
  0x66   : > { %p1052_p3 = scmp.lt.s32.totalorder %s1377_s14, 2  ;;  %s1881_s22 = smov (%p45_p8, %s43_s22), 0 }
  0x67   : > { %p1599_p10 = por %p1855_p6, %p59_p4  ;;  %p61_p5 = por %p60_p13, %p59_p4 }
  0x68   : > { %s347_s9 = sand.u32 1, %s1365_s11   ;;  %s47_s30 = ssub.s32 %s1373_s13, %s1881_s22 }
  0x69   : > { %p50_p7 = scmp.eq.s32.totalorder %s47_s30, 0  ;;  %s915_s26 = sshll.u32 %s347_s9, 3 }
  0x6a   : > { %s916_s27 = sshll.u32 %s1373_s13, 7  ;;  %s1857_s0 = sld [smem:[#allocation21_spill]] }
  0x6b   : > { %s1611_s28 = scalar_select %p50_p7, %s1365_s11, %s52_s18  }
  0x6c   : > { %s351_s25 = scalar_lea.vmem [#allocation2], %s915_s26  ;;  %p1622_p11 = pnand %p1052_p3, %p61_p5 }
  0x6d   : > { %s359_s16 = sshll.u32 %s351_s25, 4  ;;  %s348_s24 = scalar_lea.sflag [#allocation3], %s347_s9  ;;  %s1618_s16 = int_to_ptr.vmem [resolvable:$true] %s359_s16 }
  0x6e   : > { %p1199_p12 = pneg %p1622_p11 }
  0x70   : > { %s1616_s23 = scalar_lea.hbm %s1857_s0, %s916_s27  ;;  %s1202_s26 = scalar_lea.hbm %s1857_s0, 256 }
  0x71   : > { %s1197_s6 = scalar_lea.hbm %s1616_s23, 128  ;;  %p1203_p2 = scmp.lt.u32.totalorder %s1616_s23, %s1857_s0 }
  0x72   : > { %p1198_p9 = scmp.ne.s32.totalorder %s1616_s23, %s1197_s6  ;;  %p1204_p4 = scmp.lt.u32.totalorder %s1202_s26, %s1197_s6 }
  0x73   : > { %p1206_p13 = scmp.lt.u32.totalorder %s1197_s6, %s1616_s23 }
  0x74   : > { %p1200_p0 = pnand %p1199_p12, %p1198_p9  ;;  %p1205_p8 = por %p1204_p4, %p1203_p2 }
  0x76   : > { %p1201_p1 = pneg %p1200_p0  ;;  %p1207_p6 = por %p1206_p13, %p1205_p8 }
  0x78   : > { %p1208_p3 = pnand %p1207_p6, %p1201_p1 }
  0x7a   : > { %1211 = shalt.err (!%p1208_p3)
}
  0x7b   : > { %s1212_s9 = scalar_lea.vmem %s1618_s16, 128  ;;  %s1384_s20 = smov [#allocation2]  }
  0x7c   : > { %p1213_p5 = scmp.ne.s32.totalorder %s1618_s16, %s1212_s9  ;;  %s1217_s25 = sshll.u32 %s1384_s20, 4  ;;  %s1218_s25 = int_to_ptr.vmem [resolvable:$false] %s1217_s25 }
  0x7d   : > { %s1219_s18 = scalar_lea.vmem %s1218_s25, 256  ;;  %p1220_p0 = scmp.lt.s32.totalorder %s1618_s16, %s1218_s25 }
  0x7e   : > { %p1215_p7 = pnand %p1213_p5, %p1199_p12  ;;  %p1221_p2 = scmp.lt.s32.totalorder %s1219_s18, %s1212_s9 }
  0x80   : > { %p1216_p9 = pneg %p1215_p7  ;;  %p1222_p4 = por %p1221_p2, %p1220_p0 }
  0x82   : > { %p1223_p8 = pnand %p1222_p4, %p1216_p9 }
  0x84   : > { %1226 = shalt.err (!%p1223_p8)
}
  0x85   : > { %1038 = dma.hbm_to_vmem [thread:$0]  (!%p1622_p11), %s1616_s23, 128, %s1618_s16, %s348_s24  }
  0x86   : > { %p1859_p1 = scmp.ne.s32.totalorder %s1851_s19, 0 }
  0x87   : > { %s1654_s6 = sand.u32 (!%p1859_p1), 1, %s1361_s10   ;;  %p1860_p12 = scmp.ne.s32.totalorder (!%p1859_p1), %s1848_s17, 0 }
  0x88   : > { %368 = sbr.rel (%p1859_p1) target bundleno = 438 (0x1b6), region = 48  ;;  %s1657_s30 = sshll.u32 (!%p1859_p1), %s1654_s6, 3 }
  0x89   : > { %s371_s26 = scalar_lea.sflag (!%p1859_p1), [#allocation3], %s1654_s6  ;;  %s374_s27 = scalar_lea.vmem (!%p1859_p1), [#allocation2], %s1657_s30 }
  0x8f   : > { %1336 = dma.done.wait (%p1860_p12), %s371_s26, 128  }
  0x90   : > { %1338 = vsyncadd (%p1860_p12), %s371_s26, 4294967168  ;;  %p1861_p11 = scmp.eq.s32.totalorder %s1472_s15, 0 }
  0x92   : > { %1340 = dma.done.wait (%p1861_p11), [#allocation6], 1024   ;;  %p1862_p13 = pmov %p1861_p11 }
  0x93   : > { %p1863_p6 = pmov %p1861_p11 }
  0x94   : > { %1342 = vsyncadd (%p1862_p13), [#allocation6], 4294966272 }
  0x95   : > { %1344 = dma.done.wait (%p1863_p6), [#allocation9], 512   ;;  %p1864_p3 = pmov %p1863_p6 }
  0x96   : > { %v1385_v0 = vmov 0.0|0.0   ;;  %vm1386_vm0 = vmmov 0   ;;  %v1387_v1 = vmov 0.0   ;;  %v432_v2 = vld [vmem:[#allocation5] sm:$0xff]  ;;  %v433_v3 = vld [vmem:[#allocation5 + $0x8] sm:$0xff]  ;;  %v434_v4 = vld [vmem:[#allocation5 + $0x10] sm:$0xff] }
  0x97   : > { %1346 = vsyncadd (%p1864_p3), [#allocation9], 4294966784  ;;  %987 = vmatprep.subr.bf16.mxu0 %v1385_v0  ;;  %993 = vmatprep.subr.bf16.mxu1 %v1385_v0  ;;  %v988_v5 = vpack.c.bf16 %v433_v3, %v432_v2  ;;  %v435_v6 = vld [vmem:[#allocation5 + $0x18] sm:$0xff]  ;;  %v517_v7 = vld [vmem:[#allocation7] sm:$0xff]  ;;  %vm443_vm1 = vcmask 261120   ;;  %s688_s17 = sand.u32 1, %s1472_s15  }
  0x98   : > { %962 = vmatprep.mubr.msk.f32.mxu0 %vm1386_vm0, %v1387_v1  ;;  %973 = vmatprep.mubr.msk.f32.mxu1 %vm1386_vm0, %v1387_v1  ;;  %v518_v8 = vld [vmem:[#allocation7 + $0x8] sm:$0xff]  ;;  %v991_v10 = vpack.c.bf16 %v435_v6, %v434_v4  ;;  %v519_v11 = vld [vmem:[#allocation7 + $0x10] sm:$0xff]  ;;  %v520_v12 = vld [vmem:[#allocation7 + $0x18] sm:$0xff]  ;;  %s1686_s16 = sshll.u32 %s1369_s12, 7  ;;  %s423_s29 = scalar_lea.vmem [#allocation11], %s1657_s30 }
  0x99   : > { %v994_v9 = vpack.c.bf16 %v518_v8, %v517_v7  ;;  %989 = vmatpush3.bf16.msra.mxu0 %v988_v5  ;;  %v598_v13 = vld [vmem:[#allocation8] sm:$0xff]  ;;  %v599_v14 = vld [vmem:[#allocation8 + $0x8] sm:$0xff]  ;;  %v997_v15 = vpack.c.bf16 %v520_v12, %v519_v11  ;;  %v431_v16 = vld [vmem:[%s374_s27] sm:$0xff]  ;;  %s722_s9 = sshll.u32 %s423_s29, 4  ;;  %s1840_s20 = scalar_lea.vmem [#allocation10], %s1657_s30  ;;  %s1701_s9 = int_to_ptr.vmem [resolvable:$true] %s722_s9 }
  0x9a   : > { %990 = vmatprep.subr.bf16.mxu0 %v1385_v0  ;;  %v1000_v17 = vpack.c.bf16 %v599_v14, %v598_v13  ;;  %v600_v18 = vld [vmem:[#allocation8 + $0x10] sm:$0xff]  ;;  %v601_v19 = vld [vmem:[#allocation8 + $0x18] sm:$0xff]  ;;  %s708_s15 = sshll.u32 %s1840_s20, 4  ;;  %s1699_s18 = scalar_lea.hbm %s1830_s8, %s1686_s16  ;;  %s1709_s15 = int_to_ptr.vmem [resolvable:$true] %s708_s15 }
  0x9b   : > { %995 = vmatpush3.bf16.msra.mxu1 %v994_v9  ;;  %v1003_v20 = vpack.c.bf16 %v601_v19, %v600_v18  ;;  %v925_v21 = vld [vmem:[%s1826_s4] ss:$0 sm:$0xff]  ;;  %s1865_s19 = sld [smem:[#allocation24_spill]]  ;;  %s1841_s21 = scalar_lea.vmem [#allocation13], %s1657_s30 }
  0x9c   : > { %996 = vmatprep.subr.bf16.mxu1 %v1385_v0  ;;  %v927_v22 = vld [vmem:[%s1827_s5] ss:$0 sm:$0xff]  ;;  %s1715_s24 = sshll.u32 %s1841_s21, 4  ;;  %s1717_s12 = scalar_lea.sflag [#allocation12], %s688_s17  ;;  %s737_s24 = int_to_ptr.vmem [resolvable:$true] %s1715_s24 }
  0x9d   : > { %992 = vmatpush3.bf16.msra.mxu0 %v991_v10  ;;  %s1227_s25 = scalar_lea.vmem %s1701_s9, 128  ;;  %s1388_s20 = smov [#allocation11]  }
  0x9e   : > { %999 = vmatprep.subr.bf16.mxu0 %v1385_v0  ;;  %p1228_p5 = scmp.ne.s32.totalorder %s1701_s9, %s1227_s25  ;;  %s1231_s0 = sshll.u32 %s1388_s20, 4  ;;  %s1232_s0 = int_to_ptr.vmem [resolvable:$false] %s1231_s0 }
  0x9f   : > { %998 = vmatpush3.bf16.msra.mxu1 %v997_v15  ;;  %s1233_s26 = scalar_lea.vmem %s1232_s0, 256  ;;  %p1234_p0 = scmp.lt.s32.totalorder %s1701_s9, %s1232_s0 }
  0xa0   : > { %963 = vmatmul.mubr.msk.f32.vlgmr.msra.gmra.mrb[0].mxu0 %vm443_vm1, %v431_v16  ;;  %p1229_p7 = pnand %p1228_p5, %p1599_p10  ;;  %p1235_p2 = scmp.lt.s32.totalorder %s1233_s26, %s1227_s25 }
  0xa1   : > { %1001 = vmatpush3.bf16.msra.mxu0 %v1000_v17  ;;  %984 = vmatprep.mubr.msk.f32.mxu0 %vm1386_vm0, %v1387_v1  ;;  %s1707_s23 = scalar_lea.hbm %s1865_s19, %s1686_s16 }
  0xa2   : > { %974 = vmatmul.mubr.msk.f32.vlgmr.msra.gmra.mrb[0].mxu1 %vm443_vm1, %v431_v16  ;;  %1002 = vmatprep.subr.bf16.mxu0 %v1385_v0  ;;  %p1230_p9 = pneg %p1229_p7  ;;  %p1236_p4 = por %p1235_p2, %p1234_p0 }
  0xa4   : > { %p1237_p8 = pnand %p1236_p4, %p1230_p9 }
  0xa5   : > { %1004 = vmatpush3.bf16.msra.mxu0 %v1003_v20 }
  0xa8   : > { %985 = vmatmul.mubr.msk.f32.vlgmr.msra.gmra.mrb[2].mxu0 %vm443_vm1, %v431_v16 }
 0x173   : > { %v513_v23 = vpop.f32.mrb[0].mxu0 }
 0x174   : > { %v514_v24 = vadd.f32 %v925_v21, %v513_v23  ;;  %v964_v25 = vpop.f32.mrb[1].mxu0 }
 0x175   : > { %v594_v26 = vpop.f32.mrb[0].mxu1 }
 0x176   : > { %v595_v27 = vadd.f32 %v927_v22, %v594_v26  ;;  %v975_v28 = vpop.f32.mrb[1].mxu1  ;;  %v679_v29 = vmul.f32 0.35355338, %v514_v24 }
 0x178   : > { %681 = vst.msk [vmem:[%s423_s29] sm:$0xff] %vm443_vm1, %v595_v27 }
 0x179   : > { %1240 = shalt.err (!%p1237_p8)
}
 0x17a   : > { %s1241_s17 = scalar_lea.hbm %s1699_s18, 128  ;;  %s1245_s20 = scalar_lea.hbm %s1830_s8, 256 }
 0x17b   : > { %p1242_p1 = scmp.ne.s32.totalorder %s1699_s18, %s1241_s17  ;;  %p1246_p13 = scmp.lt.u32.totalorder %s1699_s18, %s1830_s8 }
 0x17c   : > { %p1247_p6 = scmp.lt.u32.totalorder %s1245_s20, %s1241_s17  ;;  %p1249_p5 = scmp.lt.u32.totalorder %s1241_s17, %s1699_s18 }
 0x17d   : > { %p1243_p12 = pnand %p1242_p1, %p1599_p10 }
 0x17e   : > { %p1248_p3 = por %p1247_p6, %p1246_p13 }
 0x17f   : > { %p1244_p11 = pneg %p1243_p12 }
 0x180   : > { %p1250_p7 = por %p1249_p5, %p1248_p3 }
 0x182   : > { %p1251_p9 = pnand %p1250_p7, %p1244_p11 }
 0x184   : > { %1254 = shalt.err (!%p1251_p9)
}
 0x185   : > { %1020 = dma.vmem_to_hbm [thread:$0]  (%p1599_p10), %s1701_s9, 128, %s1699_s18, %s1717_s12  }
 0x186   : > { %s1866_s21 = scalar_lea.vmem [#allocation10], %s1657_s30  ;;  %s1867_s17 = sld [smem:[#allocation23_spill]] }
 0x187   : > { %680 = vst.msk [vmem:[%s1866_s21] sm:$0xff] %vm443_vm1, %v679_v29  ;;  %s684_s29 = scalar_lea.sflag [#allocation4], %s1654_s6  ;;  %s1255_s27 = scalar_lea.vmem %s1709_s15, 128 }
 0x188   : > { %p1256_p0 = scmp.ne.s32.totalorder %s1709_s15, %s1255_s27  ;;  %s1389_s20 = smov [#allocation10]  }
 0x189   : > { %s1259_s0 = sshll.u32 %s1389_s20, 4  ;;  %s1260_s0 = int_to_ptr.vmem [resolvable:$false] %s1259_s0 }
 0x18a   : > { %p1257_p2 = pnand %p1256_p0, %p1599_p10  ;;  %s1261_s1 = scalar_lea.vmem %s1260_s0, 256 }
 0x18b   : > { %p1262_p8 = scmp.lt.s32.totalorder %s1709_s15, %s1260_s0  ;;  %p1263_p1 = scmp.lt.s32.totalorder %s1261_s1, %s1255_s27 }
 0x18c   : > { %v929_v30 = vld [vmem:[%s1867_s17] ss:$0 sm:$0xff]  ;;  %p1258_p4 = pneg %p1257_p2 }
 0x18d   : > { %p1264_p12 = por %p1263_p1, %p1262_p8 }
 0x18f   : > { %p1265_p11 = pnand %p1264_p12, %p1258_p4 }
 0x191   : > { %1268 = shalt.err (!%p1265_p11)
}
 0x192   : > { %s1269_s6 = scalar_lea.hbm %s1707_s23, 128  ;;  %s1273_s21 = scalar_lea.hbm %s1865_s19, 256 }
 0x193   : > { %p1270_p13 = scmp.ne.s32.totalorder %s1707_s23, %s1269_s6  ;;  %p1274_p5 = scmp.lt.u32.totalorder %s1707_s23, %s1865_s19 }
 0x194   : > { %p1275_p7 = scmp.lt.u32.totalorder %s1273_s21, %s1269_s6  ;;  %p1277_p0 = scmp.lt.u32.totalorder %s1269_s6, %s1707_s23 }
 0x195   : > { %p1271_p6 = pnand %p1270_p13, %p1599_p10 }
 0x196   : > { %p1276_p9 = por %p1275_p7, %p1274_p5 }
 0x197   : > { %p1272_p3 = pneg %p1271_p6 }
 0x198   : > { %p1278_p2 = por %p1277_p0, %p1276_p9 }
 0x19a   : > { %p1279_p4 = pnand %p1278_p2, %p1272_p3 }
 0x19c   : > { %1282 = shalt.err (!%p1279_p4)
}
 0x19d   : > { %1019 = dma.vmem_to_hbm [thread:$0]  (%p1599_p10), %s1709_s15, 128, %s1707_s23, %s684_s29   ;;  %v675_v31 = vpop.f32.mrb[2].mxu0 }
 0x19e   : > { %v676_v32 = vadd.f32 %v929_v30, %v675_v31  ;;  %v986_v33 = vpop.f32.mrb[3].mxu0  ;;  %s1868_s27 = sld [smem:[#allocation25_spill]]  ;;  %s1869_s0 = scalar_lea.vmem [#allocation13], %s1657_s30 }
 0x19f   : > { %s1283_s6 = scalar_lea.vmem %s737_s24, 128  ;;  %s1390_s9 = smov [#allocation13]  }
 0x1a0   : > { %682 = vst.msk [vmem:[%s1869_s0] sm:$0xff] %vm443_vm1, %v676_v32  ;;  %p1284_p8 = scmp.ne.s32.totalorder %s737_s24, %s1283_s6  ;;  %s1287_s18 = sshll.u32 %s1390_s9, 4  ;;  %s1288_s18 = int_to_ptr.vmem [resolvable:$false] %s1287_s18 }
 0x1a1   : > { %s1289_s15 = scalar_lea.vmem %s1288_s18, 256  ;;  %p1290_p11 = scmp.lt.s32.totalorder %s737_s24, %s1288_s18 }
 0x1a2   : > { %p1285_p1 = pnand %p1284_p8, %p1599_p10  ;;  %p1291_p13 = scmp.lt.s32.totalorder %s1289_s15, %s1283_s6 }
 0x1a4   : > { %s1773_s20 = scalar_lea.hbm %s1868_s27, %s1686_s16  ;;  %p1286_p12 = pneg %p1285_p1 }
 0x1a5   : > { %p1292_p6 = por %p1291_p13, %p1290_p11 }
 0x1a7   : > { %p1293_p3 = pnand %p1292_p6, %p1286_p12 }
 0x1a9   : > { %1296 = shalt.err (!%p1293_p3)
}
 0x1aa   : > { %s1297_s30 = scalar_lea.hbm %s1773_s20, 128  ;;  %s1301_s29 = scalar_lea.hbm %s1868_s27, 256 }
 0x1ab   : > { %p1298_p5 = scmp.ne.s32.totalorder %s1773_s20, %s1297_s30  ;;  %p1302_p0 = scmp.lt.u32.totalorder %s1773_s20, %s1868_s27 }
 0x1ac   : > { %p1303_p2 = scmp.lt.u32.totalorder %s1301_s29, %s1297_s30  ;;  %p1305_p8 = scmp.lt.u32.totalorder %s1297_s30, %s1773_s20 }
 0x1ad   : > { %p1299_p7 = pnand %p1298_p5, %p1599_p10 }
 0x1ae   : > { %p1304_p4 = por %p1303_p2, %p1302_p0 }
 0x1af   : > { %p1300_p9 = pneg %p1299_p7 }
 0x1b0   : > { %p1306_p1 = por %p1305_p8, %p1304_p4 }
 0x1b2   : > { %p1307_p12 = pnand %p1306_p1, %p1300_p9 }
 0x1b4   : > { %1310 = shalt.err (!%p1307_p12)
}
 0x1b5   : > { %1021 = dma.vmem_to_hbm [thread:$0]  (%p1599_p10), %s737_s24, 128, %s1773_s20, %s1717_s12  }
 0x1b6 PF: > { %s1870_s26 = sld [smem:[#allocation19_spill]]  ;;  %s1871_s1 = sld [smem:[#allocation20_spill]] }
 0x1b7   : > { %p1873_p13 = scmp.ge.s32.totalorder %s1377_s14, 2 }
 0x1bc   : > { %s748_s17 = sand.u32 1, %s1870_s26   ;;  %p1872_p11 = scmp.ne.s32.totalorder %s1871_s1, 0 }
 0x1bd   : > { %s749_s0 = scalar_lea.sflag [#allocation4], %s748_s17 }
 0x1be   : > { %p1040_p6 = pnand %p1873_p13, %p1872_p11 }
 0x1c0   : > { %1348 = dma.done.wait (!%p1040_p6), %s749_s0, 128  }
 0x1c1   : > { %1350 = vsyncadd (!%p1040_p6), %s749_s0, 4294967168  ;;  %s1874_s6 = sadd.s32 4294967294, %s1377_s14  }
 0x1c2   : > { %s757_s9 = sand.u32 1, %s1874_s6  }
 0x1c3   : > { %s758_s18 = scalar_lea.sflag [#allocation12], %s757_s9 }
 0x1c4   : > { %1352 = dma.done.wait (!%p1040_p6), %s758_s18, 256  }
 0x1c5   : > { %1354 = vsyncadd (!%p1040_p6), %s758_s18, 4294967040  ;;  %s31_s14 = sadd.s32 1, %s1377_s14   ;;  %s1875_s30 = smov %s1361_s10 }
 0x1c6   : > { %p28_p10 = scmp.ge.s32.totalorder %s31_s14, 4   ;;  %s1876_s10 = smov %s1365_s11 }
 0x1c7   : > { %s1877_s11 = smov %s1611_s28  ;;  %s1878_s12 = smov %s1373_s13 }
 0x1c8   : > { %s1879_s13 = smov %s1881_s22  ;;  %30 = sbr.rel (!%p28_p10) target bundleno = 16 (0x10), region = 137 }
 0x1cf   :  { %772 = vsyncpa [#allocation3], 1 }
 0x1d0   :  { %774 = vsyncpa [#allocation3 + $0x1], 1 }
 0x1d1   :  { %775 = vsyncpa [#allocation6], 1 }
 0x1d2   :  { %776 = vsyncpa [#allocation9], 1 }
 0x1d3   :  { %777 = vsyncpa [#allocation4], 1 }
 0x1d4   :  { %779 = vsyncpa [#allocation4 + $0x1], 1 }
 0x1d5   :  { %780 = vsyncpa [#allocation12], 1 }
 0x1d6   :  { %782 = vsyncpa [#allocation12 + $0x1], 1 }

</bundles_post_ra>
